<compile_context>
chip_gen: v7x
topology: tpu7x:2x2x1
jax: 0.10.0
libtpu: 0.0.40
codegen_flags: <defaults>
</compile_context>

<pallas_src>
import functools

import jax
import jax.numpy as jnp
from jax.experimental import pallas as pl
from jax.experimental.pallas import tpu as pltpu

NUM_DOMAIN = 10
IN_DIM = 42
HID_DIM = 20

_DEFAULT_BATCH_TILE = 4096  # rows per grid step; safe on v5e/v6e/v7x VMEM


def _round_up(n, m):
    return ((n + m - 1) // m) * m


def _mlp_kernel(x_ref, w1_ref, b1_ref, w2_ref, b2_ref, w3_ref, b3_ref, o_ref):
    # Layer 1: Linear(42 -> 20) + ReLU.  MXU accumulates in f32.
    x = x_ref[...]
    h1 = jnp.dot(x, w1_ref[...], preferred_element_type=jnp.float32)
    h1 = jnp.maximum(h1 + b1_ref[...].astype(jnp.float32), 0.0)

    # Layer 2: Linear(20 -> 20) + ReLU
    h2 = jnp.dot(h1.astype(w2_ref.dtype), w2_ref[...],
                 preferred_element_type=jnp.float32)
    h2 = jnp.maximum(h2 + b2_ref[...].astype(jnp.float32), 0.0)

    # Layer 3: Linear(20 -> num_domain), no activation
    o = jnp.dot(h2.astype(w3_ref.dtype), w3_ref[...],
                preferred_element_type=jnp.float32)
    o_ref[...] = (o + b3_ref[...].astype(jnp.float32)).astype(o_ref.dtype)


def cond_domain_classifier(x, params, *, batch_tile=_DEFAULT_BATCH_TILE,
                           stream_dtype=None):
    """Pallas forward of CondDomainClassifier.

    x:      (B, 42) float32
    params: dict with w1 (42,20), b1 (1,20), w2 (20,20), b2 (1,20),
            w3 (20,10), b3 (1,10)   -- weights already transposed to (in, out).
    stream_dtype: optionally cast x and weights (e.g. jnp.bfloat16) to halve
            HBM traffic; accumulation stays f32 inside the kernel.
    returns (B, num_domain) float32
    """
    B, in_dim = x.shape
    assert in_dim == IN_DIM, f"expected {IN_DIM} input features, got {in_dim}"

    w1, b1 = params["w1"], params["b1"]
    w2, b2 = params["w2"], params["b2"]
    w3, b3 = params["w3"], params["b3"]
    if stream_dtype is not None:
        x = x.astype(stream_dtype)
        w1, w2, w3 = (w.astype(stream_dtype) for w in (w1, w2, w3))

    # Batch tile: multiple of 8 (f32 sublane), capped so VMEM stays tiny.
    tb = min(batch_tile, _round_up(B, 8))
    b_pad = _round_up(B, tb)
    if b_pad != B:
        x = jnp.pad(x, ((0, b_pad - B), (0, 0)))
    grid = (b_pad // tb,)

    # x / out stream per grid step; weights & biases are whole-array and
    # VMEM-resident (constant index_map -> DMA'd once).
    x_spec = pl.BlockSpec((tb, IN_DIM), lambda i: (i, 0),
                          memory_space=pltpu.VMEM)
    out_spec = pl.BlockSpec((tb, NUM_DOMAIN), lambda i: (i, 0),
                            memory_space=pltpu.VMEM)

    def resident(a):
        return pl.BlockSpec(a.shape, lambda i: (0, 0), memory_space=pltpu.VMEM)

    weight_args = (w1, b1, w2, b2, w3, b3)

    flops = 2 * b_pad * (IN_DIM * HID_DIM + HID_DIM * HID_DIM
                         + HID_DIM * NUM_DOMAIN)
    weight_bytes = sum(int(a.size) * a.dtype.itemsize for a in weight_args)
    bytes_accessed = (int(x.size) * x.dtype.itemsize
                      + b_pad * NUM_DOMAIN * 4
                      + weight_bytes)

    out = pl.pallas_call(
        _mlp_kernel,
        out_shape=jax.ShapeDtypeStruct((b_pad, NUM_DOMAIN), jnp.float32),
        grid=grid,
        in_specs=[x_spec] + [resident(a) for a in weight_args],
        out_specs=out_spec,
        compiler_params=pltpu.CompilerParams(
            dimension_semantics=("parallel",)),
        cost_estimate=pl.CostEstimate(
            flops=flops, transcendentals=0, bytes_accessed=bytes_accessed),
    )(x, *weight_args)

    return out[:B] if b_pad != B else out


def init_params(key):
    """Deterministic init mimicking nn.Linear default uniform(-1/sqrt(fan_in), +)."""
    def linear(key, fan_in, fan_out):
        kw, kb = jax.random.split(key)
        bound = 1.0 / jnp.sqrt(fan_in)
        # Stored as (in, out): equivalent to torch weight (out, in) transposed.
        w = jax.random.uniform(kw, (fan_in, fan_out), jnp.float32, -bound, bound)
        b = jax.random.uniform(kb, (1, fan_out), jnp.float32, -bound, bound)
        return w, b

    k1, k2, k3 = jax.random.split(key, 3)
    w1, b1 = linear(k1, IN_DIM, HID_DIM)
    w2, b2 = linear(k2, HID_DIM, HID_DIM)
    w3, b3 = linear(k3, HID_DIM, NUM_DOMAIN)
    return dict(w1=w1, b1=b1, w2=w2, b2=b2, w3=w3, b3=b3)


def reference_forward(x, p):
    h1 = jnp.maximum(x @ p["w1"] + p["b1"], 0.0)
    h2 = jnp.maximum(h1 @ p["w2"] + p["b2"], 0.0)
    return h2 @ p["w3"] + p["b3"]


if __name__ == "__main__":
    key = jax.random.PRNGKey(0)
    kx, kp = jax.random.split(key)

    # Small demo shapes; batch deliberately NOT a multiple of the tile to
    # exercise the padding path. (For tiny batches like this the kernel is
    # launch-overhead bound; it pays off at large B where tiles stream.)
    batch = 100
    x = jax.random.normal(kx, (batch, IN_DIM), dtype=jnp.float32)
    params = init_params(kp)

    out = cond_domain_classifier(x, params)
    out = jax.block_until_ready(out)

    # sanity check against a pure-JAX reference
    ref = reference_forward(x, params)
    assert out.shape == (batch, NUM_DOMAIN)
    assert jnp.allclose(out, ref, atol=1e-5, rtol=1e-5)

    # Optional bf16-streaming path (looser tolerance: bf16 inputs/weights).
    out_bf16 = jax.block_until_ready(
        cond_domain_classifier(x, params, stream_dtype=jnp.bfloat16))
    assert jnp.allclose(out_bf16, ref, atol=5e-2, rtol=5e-2)

    print("KERNEL_OK")
</pallas_src>

<mosaic_0001>
module attributes {stable_mosaic.version = 11 : i64} {
  func.func @_mlp_kernel(%arg0: i32, %arg1: memref<104x42xf32, #tpu.memory_space<vmem>>, %arg2: memref<42x20xf32, #tpu.memory_space<vmem>>, %arg3: memref<1x20xf32, #tpu.memory_space<vmem>>, %arg4: memref<20x20xf32, #tpu.memory_space<vmem>>, %arg5: memref<1x20xf32, #tpu.memory_space<vmem>>, %arg6: memref<20x10xf32, #tpu.memory_space<vmem>>, %arg7: memref<1x10xf32, #tpu.memory_space<vmem>>, %arg8: memref<104x10xf32, #tpu.memory_space<vmem>>) attributes {dimension_semantics = [#tpu.dimension_semantics<parallel>], iteration_bounds = array<i64: 1>, scalar_prefetch = 0 : i64, scratch_operands = 0 : i64, tpu.core_type = #tpu.core_type<tc>, window_params = [{transform_indices = @transform_0, window_bounds = array<i64: 104, 42>}, {pipeline_mode = #tpu.pipeline_mode<synchronous>, transform_indices = @transform_1, window_bounds = array<i64: 42, 20>}, {pipeline_mode = #tpu.pipeline_mode<synchronous>, transform_indices = @transform_2, window_bounds = array<i64: 1, 20>}, {pipeline_mode = #tpu.pipeline_mode<synchronous>, transform_indices = @transform_3, window_bounds = array<i64: 20, 20>}, {pipeline_mode = #tpu.pipeline_mode<synchronous>, transform_indices = @transform_4, window_bounds = array<i64: 1, 20>}, {pipeline_mode = #tpu.pipeline_mode<synchronous>, transform_indices = @transform_5, window_bounds = array<i64: 20, 10>}, {pipeline_mode = #tpu.pipeline_mode<synchronous>, transform_indices = @transform_6, window_bounds = array<i64: 1, 10>}, {transform_indices = @transform_7, window_bounds = array<i64: 104, 10>}]} {
    %c0 = arith.constant 0 : index
    %c0_0 = arith.constant 0 : index
    %0 = vector.load %arg1[%c0, %c0_0] : memref<104x42xf32, #tpu.memory_space<vmem>>, vector<104x42xf32>
    %c0_1 = arith.constant 0 : index
    %c0_2 = arith.constant 0 : index
    %1 = vector.load %arg2[%c0_1, %c0_2] : memref<42x20xf32, #tpu.memory_space<vmem>>, vector<42x20xf32>
    %cst = arith.constant dense<0.000000e+00> : vector<104x20xf32>
    %2 = tpu.matmul %0, %1, %cst {dimension_numbers = #tpu.dot_dimension_numbers<[1], [0], [0], [1], [0, 0, 1, 1], [], []>} : vector<104x42xf32>, vector<42x20xf32>, vector<104x20xf32> -> vector<104x20xf32>
    %c0_3 = arith.constant 0 : index
    %c0_4 = arith.constant 0 : index
    %3 = vector.load %arg3[%c0_3, %c0_4] : memref<1x20xf32, #tpu.memory_space<vmem>>, vector<1x20xf32>
    %4 = vector.broadcast %3 : vector<1x20xf32> to vector<104x20xf32>
    %5 = arith.addf %2, %4 : vector<104x20xf32>
    %cst_5 = arith.constant 0.000000e+00 : f32
    %6 = vector.broadcast %cst_5 : f32 to vector<104x20xf32>
    %7 = arith.maximumf %5, %6 : vector<104x20xf32>
    %c0_6 = arith.constant 0 : index
    %c0_7 = arith.constant 0 : index
    %8 = vector.load %arg4[%c0_6, %c0_7] : memref<20x20xf32, #tpu.memory_space<vmem>>, vector<20x20xf32>
    %cst_8 = arith.constant dense<0.000000e+00> : vector<104x20xf32>
    %9 = tpu.matmul %7, %8, %cst_8 {dimension_numbers = #tpu.dot_dimension_numbers<[1], [0], [0], [1], [0, 0, 1, 1], [], []>} : vector<104x20xf32>, vector<20x20xf32>, vector<104x20xf32> -> vector<104x20xf32>
    %c0_9 = arith.constant 0 : index
    %c0_10 = arith.constant 0 : index
    %10 = vector.load %arg5[%c0_9, %c0_10] : memref<1x20xf32, #tpu.memory_space<vmem>>, vector<1x20xf32>
    %11 = vector.broadcast %10 : vector<1x20xf32> to vector<104x20xf32>
    %12 = arith.addf %9, %11 : vector<104x20xf32>
    %cst_11 = arith.constant 0.000000e+00 : f32
    %13 = vector.broadcast %cst_11 : f32 to vector<104x20xf32>
    %14 = arith.maximumf %12, %13 : vector<104x20xf32>
    %c0_12 = arith.constant 0 : index
    %c0_13 = arith.constant 0 : index
    %15 = vector.load %arg6[%c0_12, %c0_13] : memref<20x10xf32, #tpu.memory_space<vmem>>, vector<20x10xf32>
    %cst_14 = arith.constant dense<0.000000e+00> : vector<104x10xf32>
    %16 = tpu.matmul %14, %15, %cst_14 {dimension_numbers = #tpu.dot_dimension_numbers<[1], [0], [0], [1], [0, 0, 1, 1], [], []>} : vector<104x20xf32>, vector<20x10xf32>, vector<104x10xf32> -> vector<104x10xf32>
    %c0_15 = arith.constant 0 : index
    %c0_16 = arith.constant 0 : index
    %17 = vector.load %arg7[%c0_15, %c0_16] : memref<1x10xf32, #tpu.memory_space<vmem>>, vector<1x10xf32>
    %18 = vector.broadcast %17 : vector<1x10xf32> to vector<104x10xf32>
    %19 = arith.addf %16, %18 : vector<104x10xf32>
    %c0_17 = arith.constant 0 : index
    %c0_18 = arith.constant 0 : index
    %20 = vector.load %arg8[%c0_17, %c0_18] : memref<104x10xf32, #tpu.memory_space<vmem>>, vector<104x10xf32>
    tpu.vector_store %arg8[%c0_17, %c0_18], %19 {strides = array<i32>} : memref<104x10xf32, #tpu.memory_space<vmem>>, vector<104x10xf32>,
    return
  }
  func.func @transform_0(%arg0: i32) -> (i32, i32) {
    %c0_i32 = arith.constant 0 : i32
    %c0_i32_0 = arith.constant 0 : i32
    return %arg0, %c0_i32 : i32, i32
  }
  func.func @transform_1(%arg0: i32) -> (i32, i32) {
    %c0_i32 = arith.constant 0 : i32
    %c0_i32_0 = arith.constant 0 : i32
    %c0_i32_1 = arith.constant 0 : i32
    return %c0_i32, %c0_i32_0 : i32, i32
  }
  func.func @transform_2(%arg0: i32) -> (i32, i32) {
    %c0_i32 = arith.constant 0 : i32
    %c0_i32_0 = arith.constant 0 : i32
    %c0_i32_1 = arith.constant 0 : i32
    return %c0_i32, %c0_i32_0 : i32, i32
  }
  func.func @transform_3(%arg0: i32) -> (i32, i32) {
    %c0_i32 = arith.constant 0 : i32
    %c0_i32_0 = arith.constant 0 : i32
    %c0_i32_1 = arith.constant 0 : i32
    return %c0_i32, %c0_i32_0 : i32, i32
  }
  func.func @transform_4(%arg0: i32) -> (i32, i32) {
    %c0_i32 = arith.constant 0 : i32
    %c0_i32_0 = arith.constant 0 : i32
    %c0_i32_1 = arith.constant 0 : i32
    return %c0_i32, %c0_i32_0 : i32, i32
  }
  func.func @transform_5(%arg0: i32) -> (i32, i32) {
    %c0_i32 = arith.constant 0 : i32
    %c0_i32_0 = arith.constant 0 : i32
    %c0_i32_1 = arith.constant 0 : i32
    return %c0_i32, %c0_i32_0 : i32, i32
  }
  func.func @transform_6(%arg0: i32) -> (i32, i32) {
    %c0_i32 = arith.constant 0 : i32
    %c0_i32_0 = arith.constant 0 : i32
    %c0_i32_1 = arith.constant 0 : i32
    return %c0_i32, %c0_i32_0 : i32, i32
  }
  func.func @transform_7(%arg0: i32) -> (i32, i32) {
    %c0_i32 = arith.constant 0 : i32
    %c0_i32_0 = arith.constant 0 : i32
    return %arg0, %c0_i32 : i32, i32
  }
}

</mosaic_0001>

<bundles_post_ra>
// kernel: tpu_custom_call.1
= control target key start
LH: loop header
LB: loop body
LE: loop exit
PB: predicated region body
PF: predicated region fallthrough
CT: control target
= control target key end

     0   :  { %v897_v0 = vmov 0.0|0.0   ;;  %vm898_vm0 = vmmov 0   ;;  %v899_v6 = vmov 0.0   ;;  %vm92_vm1 = vcmask 1041408   ;;  %s1230_s1 = inlined_call_operand.vmem [shape: f32[42,20], index: 1, kind: input, shape index: {}]   ;;  %s1231_s3 = inlined_call_operand.vmem [shape: f32[20,20], index: 3, kind: input, shape index: {}]   ;;  %s1232_s0 = inlined_call_operand.vmem [shape: f32[104,42], index: 0, kind: input, shape index: {}]   ;;  %s1233_s2 = inlined_call_operand.vmem [shape: f32[1,20], index: 2, kind: input, shape index: {}]   ;;  %s1234_s5 = inlined_call_operand.vmem [shape: f32[20,10], index: 5, kind: input, shape index: {}]   ;;  %s1235_s4 = inlined_call_operand.vmem [shape: f32[1,20], index: 4, kind: input, shape index: {}]   ;;  %s1236_s6 = inlined_call_operand.vmem [shape: f32[1,10], index: 6, kind: input, shape index: {}]   ;;  %s1237_s7 = inlined_call_operand.vmem [shape: f32[104,10], index: 7, kind: output, shape index: {}]  }
   0x1   :  { %873 = vmatprep.subr.bf16.mxu0 %v897_v0  ;;  %v39_v1 = vld [vmem:[%s1230_s1] sm:$0xff]  ;;  %v40_v2 = vld [vmem:[%s1230_s1 + $0x8] sm:$0xff]  ;;  %v41_v3 = vld [vmem:[%s1230_s1 + $0x10] sm:$0xff]  ;;  %889 = vmatprep.subr.bf16.mxu1 %v897_v0  ;;  %vm900_vm2 = vmmov 1   ;;  %vm52_vm4 = vcmask 343040   ;;  %vm289_vm5 = vcmask 1043456  }
   0x2   :  { %v874_v4 = vpack.c.bf16 %v40_v2, %v39_v1  ;;  %v42_v5 = vld [vmem:[%s1230_s1 + $0x18] sm:$0xff]  ;;  %744 = vmatprep.mubr.msk.f32.mxu0 %vm898_vm0, %v899_v6  ;;  %804 = vmatprep.mubr.msk.f32.mxu1 %vm898_vm0, %v899_v6  ;;  %v43_v8 = vld [vmem:[%s1230_s1 + $0x20] sm:$0xff]  ;;  %v44_v9 = vld [vmem:[%s1230_s1 + $0x28] sm:$0x3]  ;;  %vm249_vm6 = vcmask 162816   ;;  %vm618_vm7 = vcmask 80896  }
   0x3   :  { %v877_v7 = vpack.c.bf16 %v42_v5, %v41_v3  ;;  %v239_v10 = vld [vmem:[%s1231_s3] sm:$0xff]  ;;  %v880_v11 = vpack.c.bf16 %v44_v9, %v43_v8  ;;  %v240_v12 = vld [vmem:[%s1231_s3 + $0x8] sm:$0xff]  ;;  %vm881_vm3 = vmpackc.low %vm92_vm1, %vm900_vm2 }
   0x4   :  { %875 = vmatpush3.bf16.msra.mxu0 %v874_v4  ;;  %v884_v13 = vpack.c.bf16 %v240_v12, %v239_v10  ;;  %v26_v14 = vld [vmem:[%s1232_s0] sm:$0xff]  ;;  %v241_v15 = vld [vmem:[%s1231_s3 + $0x10] sm:$0xf]  ;;  %v27_v16 = vld [vmem:[%s1232_s0 + $0x8] sm:$0xff] }
   0x5   :  { %876 = vmatprep.subr.bf16.mxu0 %v897_v0  ;;  %v28_v17 = vld [vmem:[%s1232_s0 + $0x10] sm:$0xff]  ;;  %v29_v18 = vld [vmem:[%s1232_s0 + $0x18] sm:$0xff]  ;;  %v30_v19 = vld [vmem:[%s1232_s0 + $0x20] sm:$0xff] }
   0x6   :  { %891 = vmatpush3.bf16.msra.mxu1 %v884_v13  ;;  %v31_v20 = vld [vmem:[%s1232_s0 + $0x28] sm:$0xff]  ;;  %v32_v21 = vld [vmem:[%s1232_s0 + $0x30] sm:$0xff]  ;;  %v33_v22 = vld [vmem:[%s1232_s0 + $0x38] sm:$0xff] }
   0x7   :  { %890 = vmatprep.subr.mxu1 %v899_v6  ;;  %v34_v23 = vld [vmem:[%s1232_s0 + $0x40] sm:$0xff]  ;;  %v35_v24 = vld [vmem:[%s1232_s0 + $0x48] sm:$0xff]  ;;  %v36_v25 = vld [vmem:[%s1232_s0 + $0x50] sm:$0xff] }
   0x8   :  { %878 = vmatpush3.bf16.msra.mxu0 %v877_v7  ;;  %v37_v26 = vld [vmem:[%s1232_s0 + $0x58] sm:$0xff]  ;;  %v38_v27 = vld [vmem:[%s1232_s0 + $0x60] sm:$0xff]  ;;  %v437_v50 = vld [vmem:[%s1234_s5 + $0x8] sm:$0xff] }
   0x9   :  { %879 = vmatprep.subr.bf16.mxu0 %v897_v0  ;;  %v1057_v28 = vld [vmem:[%s1233_s2] ss:$0 sm:$0xff]  ;;  %v438_v60 = vld [vmem:[%s1234_s5 + $0x10] sm:$0xf] }
   0xa   :  { %892 = vmatpush3.msk.msra.mxu1 %vm289_vm5, %v241_v15  ;;  %v436_v49 = vld [vmem:[%s1234_s5] sm:$0xff] }
   0xb   :  { %886 = vmatprep.subr.bf16.mxu1 %v897_v0  ;;  %v887_v54 = vpack.c.bf16 %v437_v50, %v436_v49 }
   0xc   :  { %882 = vmatpush3.bf16.msk.msra.mxu0 %vm881_vm3, %v880_v11 }
   0xd   :  { %883 = vmatprep.subr.bf16.mxu0 %v897_v0 }
   0xf   :  { %745 = vmatmul.mubr.msk.f32.vlgmr.msra.gmra.mrb[0].mxu0 %vm52_vm4, %v26_v14 }
  0x10   :  { %747 = vmatprep.mubr.msk.f32.mxu0 %vm898_vm0, %v899_v6  ;;  %885 = vmatpush3.bf16.msra.mxu0 %v884_v13 }
  0x11   :  { %787 = vmatprep.subr.mxu0 %v899_v6 }
  0x13   :  { %748 = vmatmul.mubr.msk.f32.gmra.mrb[2].mxu0 %vm52_vm4, %v27_v16 }
  0x14   :  { %750 = vmatprep.mubr.msk.f32.mxu0 %vm898_vm0, %v899_v6  ;;  %788 = vmatpush3.msk.msra.mxu0 %vm289_vm5, %v241_v15 }
  0x17   :  { %751 = vmatmul.mubr.msk.f32.gmra.mrb[4].mxu0 %vm52_vm4, %v28_v17 }
  0x18   :  { %753 = vmatprep.mubr.msk.f32.mxu0 %vm898_vm0, %v899_v6 }
  0x1b   :  { %754 = vmatmul.mubr.msk.f32.gmra.mrb[6].mxu0 %vm52_vm4, %v29_v18 }
  0x1c   :  { %756 = vmatprep.mubr.msk.f32.mxu0 %vm898_vm0, %v899_v6 }
  0x1f   :  { %757 = vmatmul.mubr.msk.f32.gmra.mrb[8].mxu0 %vm52_vm4, %v30_v19 }
  0x20   :  { %759 = vmatprep.mubr.msk.f32.mxu0 %vm898_vm0, %v899_v6 }
  0x23   :  { %760 = vmatmul.mubr.msk.f32.gmra.mrb[10].mxu0 %vm52_vm4, %v31_v20 }
  0x24   :  { %762 = vmatprep.mubr.msk.f32.mxu0 %vm898_vm0, %v899_v6 }
  0x27   :  { %763 = vmatmul.mubr.msk.f32.gmra.mrb[12].mxu0 %vm52_vm4, %v32_v21 }
  0x28   :  { %765 = vmatprep.mubr.msk.f32.mxu0 %vm898_vm0, %v899_v6 }
  0x2b   :  { %766 = vmatmul.mubr.msk.f32.gmra.mrb[14].mxu0 %vm52_vm4, %v33_v22  ;;  %v1123_v22 = vld [vmem:[%s1235_s4] ss:$0 sm:$0xff] }
  0x2c   :  { %768 = vmatprep.mubr.msk.f32.mxu0 %vm898_vm0, %v899_v6 }
  0x2f   :  { %769 = vmatmul.mubr.msk.f32.gmra.mrb[16].mxu0 %vm52_vm4, %v34_v23 }
  0x30   :  { %771 = vmatprep.mubr.msk.f32.mxu0 %vm898_vm0, %v899_v6 }
  0x33   :  { %772 = vmatmul.mubr.msk.f32.gmra.mrb[18].mxu0 %vm52_vm4, %v35_v24 }
  0x34   :  { %774 = vmatprep.mubr.msk.f32.mxu0 %vm898_vm0, %v899_v6 }
  0x37   :  { %775 = vmatmul.mubr.msk.f32.gmra.mrb[20].mxu0 %vm52_vm4, %v36_v25 }
  0x38   :  { %777 = vmatprep.mubr.msk.f32.mxu0 %vm898_vm0, %v899_v6 }
  0x3b   :  { %778 = vmatmul.mubr.msk.f32.gmra.mrb[22].mxu0 %vm52_vm4, %v37_v26 }
  0x3c   :  { %780 = vmatprep.mubr.msk.f32.mxu0 %vm898_vm0, %v899_v6 }
  0x3f   :  { %781 = vmatmul.mubr.msk.f32.gmra.mrb[24].mxu0 %vm52_vm4, %v38_v27 }
  0x40   :  { %789 = vmatprep.mubr.msk.f32.mxu0 %vm898_vm0, %v899_v6 }
  0xe2   :  { %v162_v29 = vpop.f32.mrb[0].mxu0 }
  0xe3   :  { %v163_v30 = vadd.f32 %v1057_v28, %v162_v29  ;;  %v746_v31 = vpop.f32.mrb[1].mxu0 }
  0xe5   :  { %v226_v32 = vmax.f32 %v163_v30, 0.0 }
  0xe6   :  { %v167_v33 = vpop.f32.mrb[2].mxu0 }
  0xe7   :  { %v168_v34 = vadd.f32 %v1057_v28, %v167_v33  ;;  %v749_v35 = vpop.f32.mrb[3].mxu0  ;;  %790 = vmatmul.mubr.msk.f32.vlgmr.msra.gmra.mrb[26].mxu0 %vm249_vm6, %v226_v32 }
  0xe8   :  { %792 = vmatprep.mubr.msk.f32.mxu0 %vm898_vm0, %v899_v6 }
  0xe9   :  { %v227_v36 = vmax.f32 %v168_v34, 0.0 }
  0xea   :  { %v172_v37 = vpop.f32.mrb[4].mxu0 }
  0xeb   :  { %v173_v38 = vadd.f32 %v1057_v28, %v172_v37  ;;  %v752_v39 = vpop.f32.mrb[5].mxu0  ;;  %793 = vmatmul.mubr.msk.f32.gmra.mrb[28].mxu0 %vm249_vm6, %v227_v36 }
  0xec   :  { %795 = vmatprep.mubr.msk.f32.mxu0 %vm898_vm0, %v899_v6 }
  0xed   :  { %v228_v40 = vmax.f32 %v173_v38, 0.0 }
  0xee   :  { %v177_v41 = vpop.f32.mrb[6].mxu0 }
  0xef   :  { %v178_v42 = vadd.f32 %v1057_v28, %v177_v41  ;;  %v755_v43 = vpop.f32.mrb[7].mxu0  ;;  %796 = vmatmul.mubr.msk.f32.gmra.mrb[30].mxu0 %vm249_vm6, %v228_v40 }
  0xf0   :  { %798 = vmatprep.mubr.msk.f32.mxu0 %vm898_vm0, %v899_v6 }
  0xf1   :  { %v229_v44 = vmax.f32 %v178_v42, 0.0 }
  0xf2   :  { %v182_v45 = vpop.f32.mrb[8].mxu0 }
  0xf3   :  { %v183_v46 = vadd.f32 %v1057_v28, %v182_v45  ;;  %v758_v47 = vpop.f32.mrb[9].mxu0  ;;  %799 = vmatmul.mubr.msk.f32.gmra.mrb[32].mxu0 %vm249_vm6, %v229_v44 }
  0xf4   :  { %801 = vmatprep.mubr.msk.f32.mxu0 %vm898_vm0, %v899_v6 }
  0xf5   :  { %v230_v48 = vmax.f32 %v183_v46, 0.0 }
  0xf6   :  { %v187_v51 = vpop.f32.mrb[10].mxu0 }
  0xf7   :  { %v188_v52 = vadd.f32 %v1057_v28, %v187_v51  ;;  %v761_v53 = vpop.f32.mrb[11].mxu0  ;;  %802 = vmatmul.mubr.msk.f32.gmra.mrb[34].mxu0 %vm249_vm6, %v230_v48 }
  0xf9   :  { %v231_v55 = vmax.f32 %v188_v52, 0.0 }
  0xfa   :  { %v192_v56 = vpop.f32.mrb[12].mxu0 }
  0xfb   :  { %v193_v57 = vadd.f32 %v1057_v28, %v192_v56  ;;  %v764_v58 = vpop.f32.mrb[13].mxu0  ;;  %805 = vmatmul.mubr.msk.f32.vlgmr.msra.gmra.mrb[0].mxu1 %vm249_vm6, %v231_v55 }
  0xfc   :  { %807 = vmatprep.mubr.msk.f32.mxu1 %vm898_vm0, %v899_v6  ;;  %888 = vmatpush3.bf16.msra.mxu1 %v887_v54 }
  0xfd   :  { %v232_v59 = vmax.f32 %v193_v57, 0.0  ;;  %832 = vmatprep.subr.mxu1 %v899_v6 }
  0xfe   :  { %v197_v61 = vpop.f32.mrb[14].mxu0 }
  0xff   :  { %v198_v62 = vadd.f32 %v1057_v28, %v197_v61  ;;  %v767_v63 = vpop.f32.mrb[15].mxu0  ;;  %808 = vmatmul.mubr.msk.f32.gmra.mrb[2].mxu1 %vm249_vm6, %v232_v59 }
 0x100   :  { %810 = vmatprep.mubr.msk.f32.mxu1 %vm898_vm0, %v899_v6  ;;  %833 = vmatpush3.msk.msra.mxu1 %vm289_vm5, %v438_v60 }
 0x101   :  { %v233_v0 = vmax.f32 %v198_v62, 0.0 }
 0x102   :  { %v202_v1 = vpop.f32.mrb[16].mxu0 }
 0x103   :  { %v203_v2 = vadd.f32 %v1057_v28, %v202_v1  ;;  %v770_v3 = vpop.f32.mrb[17].mxu0  ;;  %811 = vmatmul.mubr.msk.f32.gmra.mrb[4].mxu1 %vm249_vm6, %v233_v0 }
 0x104   :  { %813 = vmatprep.mubr.msk.f32.mxu1 %vm898_vm0, %v899_v6 }
 0x105   :  { %v234_v4 = vmax.f32 %v203_v2, 0.0 }
 0x106   :  { %v207_v5 = vpop.f32.mrb[18].mxu0 }
 0x107   :  { %v208_v7 = vadd.f32 %v1057_v28, %v207_v5  ;;  %v773_v8 = vpop.f32.mrb[19].mxu0  ;;  %814 = vmatmul.mubr.msk.f32.gmra.mrb[6].mxu1 %vm249_vm6, %v234_v4 }
 0x108   :  { %816 = vmatprep.mubr.msk.f32.mxu1 %vm898_vm0, %v899_v6 }
 0x109   :  { %v235_v9 = vmax.f32 %v208_v7, 0.0 }
 0x10a   :  { %v212_v10 = vpop.f32.mrb[20].mxu0 }
 0x10b   :  { %v213_v11 = vadd.f32 %v1057_v28, %v212_v10  ;;  %v776_v12 = vpop.f32.mrb[21].mxu0  ;;  %817 = vmatmul.mubr.msk.f32.gmra.mrb[8].mxu1 %vm249_vm6, %v235_v9 }
 0x10c   :  { %819 = vmatprep.mubr.msk.f32.mxu1 %vm898_vm0, %v899_v6  ;;  %v666_v12 = vld [vmem:[%s1236_s6] ss:$0 sm:$0xff] }
 0x10d   :  { %v236_v13 = vmax.f32 %v213_v11, 0.0 }
 0x10e   :  { %v217_v14 = vpop.f32.mrb[22].mxu0 }
 0x10f   :  { %v218_v15 = vadd.f32 %v1057_v28, %v217_v14  ;;  %v779_v16 = vpop.f32.mrb[23].mxu0  ;;  %820 = vmatmul.mubr.msk.f32.gmra.mrb[10].mxu1 %vm249_vm6, %v236_v13 }
 0x110   :  { %822 = vmatprep.mubr.msk.f32.mxu1 %vm898_vm0, %v899_v6 }
 0x111   :  { %v237_v17 = vmax.f32 %v218_v15, 0.0 }
 0x112   :  { %v222_v18 = vpop.f32.mrb[24].mxu0 }
 0x113   :  { %v223_v19 = vadd.f32 %v1057_v28, %v222_v18  ;;  %v782_v20 = vpop.f32.mrb[25].mxu0  ;;  %823 = vmatmul.mubr.msk.f32.gmra.mrb[12].mxu1 %vm249_vm6, %v237_v17 }
 0x114   :  { %825 = vmatprep.mubr.msk.f32.mxu1 %vm898_vm0, %v899_v6 }
 0x115   :  { %v238_v21 = vmax.f32 %v223_v19, 0.0 }
 0x117   :  { %826 = vmatmul.mubr.msk.f32.gmra.mrb[14].mxu1 %vm249_vm6, %v238_v21 }
 0x118   :  { %834 = vmatprep.mubr.msk.f32.mxu1 %vm898_vm0, %v899_v6 }
 0x1ba   :  { %v359_v23 = vpop.f32.mrb[26].mxu0 }
 0x1bb   :  { %v360_v24 = vadd.f32 %v1123_v22, %v359_v23  ;;  %v791_v25 = vpop.f32.mrb[27].mxu0 }
 0x1bd   :  { %v423_v26 = vmax.f32 %v360_v24, 0.0 }
 0x1be   :  { %v364_v27 = vpop.f32.mrb[28].mxu0 }
 0x1bf   :  { %v365_v28 = vadd.f32 %v1123_v22, %v364_v27  ;;  %v794_v29 = vpop.f32.mrb[29].mxu0  ;;  %835 = vmatmul.mubr.msk.f32.vlgmr.msra.gmra.mrb[16].mxu1 %vm249_vm6, %v423_v26 }
 0x1c0   :  { %837 = vmatprep.mubr.msk.f32.mxu1 %vm898_vm0, %v899_v6 }
 0x1c1   :  { %v424_v30 = vmax.f32 %v365_v28, 0.0 }
 0x1c2   :  { %v369_v31 = vpop.f32.mrb[30].mxu0 }
 0x1c3   :  { %v370_v32 = vadd.f32 %v1123_v22, %v369_v31  ;;  %v797_v33 = vpop.f32.mrb[31].mxu0  ;;  %838 = vmatmul.mubr.msk.f32.gmra.mrb[18].mxu1 %vm249_vm6, %v424_v30 }
 0x1c4   :  { %840 = vmatprep.mubr.msk.f32.mxu1 %vm898_vm0, %v899_v6 }
 0x1c5   :  { %v425_v34 = vmax.f32 %v370_v32, 0.0 }
 0x1c6   :  { %v374_v35 = vpop.f32.mrb[32].mxu0 }
 0x1c7   :  { %v375_v36 = vadd.f32 %v1123_v22, %v374_v35  ;;  %v800_v37 = vpop.f32.mrb[33].mxu0  ;;  %841 = vmatmul.mubr.msk.f32.gmra.mrb[20].mxu1 %vm249_vm6, %v425_v34 }
 0x1c8   :  { %843 = vmatprep.mubr.msk.f32.mxu1 %vm898_vm0, %v899_v6 }
 0x1c9   :  { %v426_v38 = vmax.f32 %v375_v36, 0.0 }
 0x1ca   :  { %v379_v39 = vpop.f32.mrb[34].mxu0 }
 0x1cb   :  { %v380_v40 = vadd.f32 %v1123_v22, %v379_v39  ;;  %v803_v41 = vpop.f32.mrb[35].mxu0  ;;  %844 = vmatmul.mubr.msk.f32.gmra.mrb[22].mxu1 %vm249_vm6, %v426_v38 }
 0x1cc   :  { %846 = vmatprep.mubr.msk.f32.mxu1 %vm898_vm0, %v899_v6 }
 0x1cd   :  { %v427_v42 = vmax.f32 %v380_v40, 0.0 }
 0x1ce   :  { %v384_v43 = vpop.f32.mrb[0].mxu1 }
 0x1cf   :  { %v385_v44 = vadd.f32 %v1123_v22, %v384_v43  ;;  %v806_v45 = vpop.f32.mrb[1].mxu1  ;;  %847 = vmatmul.mubr.msk.f32.gmra.mrb[24].mxu1 %vm249_vm6, %v427_v42 }
 0x1d0   :  { %849 = vmatprep.mubr.msk.f32.mxu1 %vm898_vm0, %v899_v6 }
 0x1d1   :  { %v428_v46 = vmax.f32 %v385_v44, 0.0 }
 0x1d2   :  { %v389_v47 = vpop.f32.mrb[2].mxu1 }
 0x1d3   :  { %v390_v48 = vadd.f32 %v1123_v22, %v389_v47  ;;  %v809_v49 = vpop.f32.mrb[3].mxu1  ;;  %850 = vmatmul.mubr.msk.f32.gmra.mrb[26].mxu1 %vm249_vm6, %v428_v46 }
 0x1d4   :  { %852 = vmatprep.mubr.msk.f32.mxu1 %vm898_vm0, %v899_v6 }
 0x1d5   :  { %v429_v50 = vmax.f32 %v390_v48, 0.0 }
 0x1d6   :  { %v394_v51 = vpop.f32.mrb[4].mxu1 }
 0x1d7   :  { %v395_v52 = vadd.f32 %v1123_v22, %v394_v51  ;;  %v812_v53 = vpop.f32.mrb[5].mxu1  ;;  %853 = vmatmul.mubr.msk.f32.gmra.mrb[28].mxu1 %vm249_vm6, %v429_v50 }
 0x1d8   :  { %855 = vmatprep.mubr.msk.f32.mxu1 %vm898_vm0, %v899_v6 }
 0x1d9   :  { %v430_v54 = vmax.f32 %v395_v52, 0.0 }
 0x1da   :  { %v399_v55 = vpop.f32.mrb[6].mxu1 }
 0x1db   :  { %v400_v56 = vadd.f32 %v1123_v22, %v399_v55  ;;  %v815_v57 = vpop.f32.mrb[7].mxu1  ;;  %856 = vmatmul.mubr.msk.f32.gmra.mrb[30].mxu1 %vm249_vm6, %v430_v54 }
 0x1dc   :  { %858 = vmatprep.mubr.msk.f32.mxu1 %vm898_vm0, %v899_v6 }
 0x1dd   :  { %v431_v58 = vmax.f32 %v400_v56, 0.0 }
 0x1de   :  { %v404_v59 = vpop.f32.mrb[8].mxu1 }
 0x1df   :  { %v405_v60 = vadd.f32 %v1123_v22, %v404_v59  ;;  %v818_v61 = vpop.f32.mrb[9].mxu1  ;;  %859 = vmatmul.mubr.msk.f32.gmra.mrb[32].mxu1 %vm249_vm6, %v431_v58 }
 0x1e0   :  { %861 = vmatprep.mubr.msk.f32.mxu1 %vm898_vm0, %v899_v6 }
 0x1e1   :  { %v432_v62 = vmax.f32 %v405_v60, 0.0 }
 0x1e2   :  { %v409_v63 = vpop.f32.mrb[10].mxu1 }
 0x1e3   :  { %v410_v0 = vadd.f32 %v1123_v22, %v409_v63  ;;  %v821_v1 = vpop.f32.mrb[11].mxu1  ;;  %862 = vmatmul.mubr.msk.f32.gmra.mrb[34].mxu1 %vm249_vm6, %v432_v62 }
 0x1e4   :  { %864 = vmatprep.mubr.msk.f32.mxu1 %vm898_vm0, %v899_v6 }
 0x1e5   :  { %v433_v2 = vmax.f32 %v410_v0, 0.0 }
 0x1e6   :  { %v414_v3 = vpop.f32.mrb[12].mxu1 }
 0x1e7   :  { %v415_v4 = vadd.f32 %v1123_v22, %v414_v3  ;;  %v824_v5 = vpop.f32.mrb[13].mxu1  ;;  %865 = vmatmul.mubr.msk.f32.gmra.mrb[36].mxu1 %vm249_vm6, %v433_v2 }
 0x1e8   :  { %867 = vmatprep.mubr.msk.f32.mxu1 %vm898_vm0, %v899_v6 }
 0x1e9   :  { %v434_v7 = vmax.f32 %v415_v4, 0.0 }
 0x1ea   :  { %v419_v8 = vpop.f32.mrb[14].mxu1 }
 0x1eb   :  { %v420_v9 = vadd.f32 %v1123_v22, %v419_v8  ;;  %v827_v10 = vpop.f32.mrb[15].mxu1  ;;  %868 = vmatmul.mubr.msk.f32.gmra.mrb[38].mxu1 %vm249_vm6, %v434_v7 }
 0x1ec   :  { %870 = vmatprep.mubr.msk.f32.mxu1 %vm898_vm0, %v899_v6 }
 0x1ed   :  { %v435_v11 = vmax.f32 %v420_v9, 0.0 }
 0x1ef   :  { %871 = vmatmul.mubr.msk.f32.gmra.mrb[40].mxu1 %vm249_vm6, %v435_v11 }
 0x292   :  { %v554_v13 = vpop.f32.mrb[16].mxu1 }
 0x293   :  { %v555_v14 = vadd.f32 %v666_v12, %v554_v13  ;;  %v836_v15 = vpop.f32.mrb[17].mxu1 }
 0x295   :  { %619 = vst.msk [vmem:[%s1237_s7] sm:$0xff] %vm618_vm7, %v555_v14 }
 0x296   :  { %v559_v16 = vpop.f32.mrb[18].mxu1 }
 0x297   :  { %v560_v17 = vadd.f32 %v666_v12, %v559_v16  ;;  %v839_v18 = vpop.f32.mrb[19].mxu1 }
 0x299   :  { %620 = vst.msk [vmem:[%s1237_s7 + $0x8] sm:$0xff] %vm618_vm7, %v560_v17 }
 0x29a   :  { %v564_v6 = vpop.f32.mrb[20].mxu1 }
 0x29b   :  { %v565_v19 = vadd.f32 %v666_v12, %v564_v6  ;;  %v842_v20 = vpop.f32.mrb[21].mxu1 }
 0x29d   :  { %621 = vst.msk [vmem:[%s1237_s7 + $0x10] sm:$0xff] %vm618_vm7, %v565_v19 }
 0x29e   :  { %v569_v21 = vpop.f32.mrb[22].mxu1 }
 0x29f   :  { %v570_v22 = vadd.f32 %v666_v12, %v569_v21  ;;  %v845_v23 = vpop.f32.mrb[23].mxu1 }
 0x2a1   :  { %622 = vst.msk [vmem:[%s1237_s7 + $0x18] sm:$0xff] %vm618_vm7, %v570_v22 }
 0x2a2   :  { %v574_v24 = vpop.f32.mrb[24].mxu1 }
 0x2a3   :  { %v575_v25 = vadd.f32 %v666_v12, %v574_v24  ;;  %v848_v26 = vpop.f32.mrb[25].mxu1 }
 0x2a5   :  { %623 = vst.msk [vmem:[%s1237_s7 + $0x20] sm:$0xff] %vm618_vm7, %v575_v25 }
 0x2a6   :  { %v579_v27 = vpop.f32.mrb[26].mxu1 }
 0x2a7   :  { %v580_v28 = vadd.f32 %v666_v12, %v579_v27  ;;  %v851_v29 = vpop.f32.mrb[27].mxu1 }
 0x2a9   :  { %624 = vst.msk [vmem:[%s1237_s7 + $0x28] sm:$0xff] %vm618_vm7, %v580_v28 }
 0x2aa   :  { %v584_v30 = vpop.f32.mrb[28].mxu1 }
 0x2ab   :  { %v585_v31 = vadd.f32 %v666_v12, %v584_v30  ;;  %v854_v32 = vpop.f32.mrb[29].mxu1 }
 0x2ad   :  { %625 = vst.msk [vmem:[%s1237_s7 + $0x30] sm:$0xff] %vm618_vm7, %v585_v31 }
 0x2ae   :  { %v589_v33 = vpop.f32.mrb[30].mxu1 }
 0x2af   :  { %v590_v34 = vadd.f32 %v666_v12, %v589_v33  ;;  %v857_v35 = vpop.f32.mrb[31].mxu1 }
 0x2b1   :  { %626 = vst.msk [vmem:[%s1237_s7 + $0x38] sm:$0xff] %vm618_vm7, %v590_v34 }
 0x2b2   :  { %v594_v36 = vpop.f32.mrb[32].mxu1 }
 0x2b3   :  { %v595_v37 = vadd.f32 %v666_v12, %v594_v36  ;;  %v860_v38 = vpop.f32.mrb[33].mxu1 }
 0x2b5   :  { %627 = vst.msk [vmem:[%s1237_s7 + $0x40] sm:$0xff] %vm618_vm7, %v595_v37 }
 0x2b6   :  { %v599_v39 = vpop.f32.mrb[34].mxu1 }
 0x2b7   :  { %v600_v40 = vadd.f32 %v666_v12, %v599_v39  ;;  %v863_v41 = vpop.f32.mrb[35].mxu1 }
 0x2b9   :  { %628 = vst.msk [vmem:[%s1237_s7 + $0x48] sm:$0xff] %vm618_vm7, %v600_v40 }
 0x2ba   :  { %v604_v42 = vpop.f32.mrb[36].mxu1 }
 0x2bb   :  { %v605_v43 = vadd.f32 %v666_v12, %v604_v42  ;;  %v866_v44 = vpop.f32.mrb[37].mxu1 }
 0x2bd   :  { %629 = vst.msk [vmem:[%s1237_s7 + $0x50] sm:$0xff] %vm618_vm7, %v605_v43 }
 0x2be   :  { %v609_v45 = vpop.f32.mrb[38].mxu1 }
 0x2bf   :  { %v610_v46 = vadd.f32 %v666_v12, %v609_v45  ;;  %v869_v47 = vpop.f32.mrb[39].mxu1 }
 0x2c1   :  { %630 = vst.msk [vmem:[%s1237_s7 + $0x58] sm:$0xff] %vm618_vm7, %v610_v46 }
 0x2c2   :  { %v614_v48 = vpop.f32.mrb[40].mxu1 }
 0x2c3   :  { %v615_v49 = vadd.f32 %v666_v12, %v614_v48  ;;  %v872_v50 = vpop.f32.mrb[41].mxu1 }
 0x2c5   :  { %631 = vst.msk [vmem:[%s1237_s7 + $0x60] sm:$0xff] %vm618_vm7, %v615_v49 }

</bundles_post_ra>
